<compile_context>
chip_gen: v5e
topology: v5e:2x2
jax: 0.10.0
libtpu: 0.0.40
codegen_flags: <defaults>
</compile_context>

<pallas_src>
import jax
import jax.numpy as jnp
from jax.experimental import pallas as pl
from jax.experimental.pallas import tpu as pltpu


def identity(x):
    """The Identity module forward: zero-copy, zero-HBM-byte pass-through."""
    return x


def _sublane_pack(itemsize):
    # Second-minor physical tile: 8 rows for 4B, 16 for 2B, 32 for 1B dtypes.
    return max(8, 32 // max(1, itemsize))


def _make_dma_copy_kernel(chunks):
    """Build a kernel that issues one HBM->HBM DMA per static chunk
    (start, size) along axis 0, all in flight, then waits on all of them."""

    def kernel(x_ref, o_ref, sem):
        copies = []
        for i, (start, size) in enumerate(chunks):
            cp = pltpu.make_async_copy(
                x_ref.at[pl.ds(start, size)],
                o_ref.at[pl.ds(start, size)],
                sem.at[i],
            )
            cp.start()
            copies.append(cp)
        for cp in copies:
            cp.wait()

    return kernel


def identity_pallas(x):
    """Identity implemented as an explicit Pallas copy (direct HBM->HBM DMA).

    Only use this when a materialized copy is actually required; the module's
    forward semantics are exactly `identity(x) == x`.
    """
    if x.size == 0:
        # Nothing to copy; a pallas_call would be pure overhead.
        return x

    orig_shape = x.shape
    # Scalars: give the DMA a 1-D view (free reshape for a single element).
    xin = x.reshape(1) if x.ndim == 0 else x

    itemsize = jnp.dtype(xin.dtype).itemsize
    nbytes = xin.size * itemsize
    lead = xin.shape[0]

    # Chunking along the leading axis: two in-flight DMAs for large arrays so
    # two DMA engines stream concurrently.  Keep chunk boundaries aligned to
    # the physical sublane tile when the leading axis is the second-minor dim.
    chunks = ((0, lead),)
    if nbytes >= (1 << 20) and lead >= 2:
        if xin.ndim >= 3:
            half = lead // 2
            chunks = ((0, half), (half, lead - half))
        elif xin.ndim == 2:
            pack = _sublane_pack(itemsize)
            half = (lead // 2 // pack) * pack
            if 0 < half < lead:
                chunks = ((0, half), (half, lead - half))
        # ndim == 1: keep a single DMA (no clean tile-aligned split).

    out = pl.pallas_call(
        _make_dma_copy_kernel(chunks),
        out_shape=jax.ShapeDtypeStruct(xin.shape, xin.dtype),
        in_specs=[pl.BlockSpec(memory_space=pl.ANY)],
        out_specs=pl.BlockSpec(memory_space=pl.ANY),
        scratch_shapes=[pltpu.SemaphoreType.DMA((len(chunks),))],
        cost_estimate=pl.CostEstimate(
            flops=0,
            transcendentals=0,
            bytes_accessed=2 * nbytes,
        ),
    )(xin)

    return out.reshape(orig_shape)


if __name__ == "__main__":
    key = jax.random.PRNGKey(0)

    # Small NCHW input consistent with a SimCLR encoder feed: (B, C, H, W).
    x = jax.random.normal(key, (2, 4, 16, 16), dtype=jnp.float32)

    # Module forward: pass-through (the optimal implementation).
    assert identity(x) is x

    # Explicit Pallas kernel (single HBM->HBM DMA for this small input).
    y = identity_pallas(x)
    jax.block_until_ready(y)
    assert y.shape == x.shape and y.dtype == x.dtype
    assert bool(jnp.all(y == x))

    # Odd, non-tile-aligned shape (exercises the native-layout DMA path).
    x_odd = jax.random.normal(key, (3, 5, 7), dtype=jnp.float32)
    y_odd = identity_pallas(x_odd)
    jax.block_until_ready(y_odd)
    assert y_odd.shape == x_odd.shape and y_odd.dtype == x_odd.dtype
    assert bool(jnp.all(y_odd == x_odd))

    # 1 MiB input: exercises the two-in-flight chunked DMA path.
    x_big = jax.random.normal(key, (512, 512), dtype=jnp.float32)
    y_big = identity_pallas(x_big)
    jax.block_until_ready(y_big)
    assert bool(jnp.all(y_big == x_big))

    print("KERNEL_OK")
</pallas_src>

<mosaic_0001>
module attributes {stable_mosaic.version = 11 : i64} {
  func.func @kernel(%arg0: memref<2x4x16x16xf32, #tpu.memory_space<any>>, %arg1: memref<2x4x16x16xf32, #tpu.memory_space<any>>, %arg2: memref<1x!tpu.dma_semaphore, #tpu.memory_space<semaphore_mem>>) attributes {dimension_semantics = [], scalar_prefetch = 0 : i64, scratch_operands = 1 : i64, tpu.core_type = #tpu.core_type<tc>} {
    %c0_i32 = arith.constant 0 : i32
    %c0_i32_0 = arith.constant 0 : i32
    %c0_i32_1 = arith.constant 0 : i32
    %c0_i32_2 = arith.constant 0 : i32
    %c0_i32_3 = arith.constant 0 : i32
    %0 = tpu.memref_slice %arg0[%c0_i32_0, %c0_i32_1, %c0_i32_2, %c0_i32_3] : memref<2x4x16x16xf32, #tpu.memory_space<any>> -> memref<2x4x16x16xf32, #tpu.memory_space<any>>
    %c0_i32_4 = arith.constant 0 : i32
    %c0_i32_5 = arith.constant 0 : i32
    %c0_i32_6 = arith.constant 0 : i32
    %c0_i32_7 = arith.constant 0 : i32
    %1 = tpu.memref_slice %arg1[%c0_i32_4, %c0_i32_5, %c0_i32_6, %c0_i32_7] : memref<2x4x16x16xf32, #tpu.memory_space<any>> -> memref<2x4x16x16xf32, #tpu.memory_space<any>>
    %2 = tpu.memref_slice %arg2[%c0_i32] : memref<1x!tpu.dma_semaphore, #tpu.memory_space<semaphore_mem>> -> memref<1x!tpu.dma_semaphore, #tpu.memory_space<semaphore_mem>>
    %3 = tpu.memref_squeeze %2 : memref<1x!tpu.dma_semaphore, #tpu.memory_space<semaphore_mem>> -> memref<!tpu.dma_semaphore, #tpu.memory_space<semaphore_mem>>
    tpu.enqueue_dma source(%0 : memref<2x4x16x16xf32, #tpu.memory_space<any>>) target(%1 : memref<2x4x16x16xf32, #tpu.memory_space<any>>) target_semaphore(%3 : memref<!tpu.dma_semaphore, #tpu.memory_space<semaphore_mem>>)
    %c0_i32_8 = arith.constant 0 : i32
    %c0_i32_9 = arith.constant 0 : i32
    %c0_i32_10 = arith.constant 0 : i32
    %c0_i32_11 = arith.constant 0 : i32
    %c0_i32_12 = arith.constant 0 : i32
    %4 = tpu.memref_slice %arg0[%c0_i32_9, %c0_i32_10, %c0_i32_11, %c0_i32_12] : memref<2x4x16x16xf32, #tpu.memory_space<any>> -> memref<2x4x16x16xf32, #tpu.memory_space<any>>
    %c0_i32_13 = arith.constant 0 : i32
    %c0_i32_14 = arith.constant 0 : i32
    %c0_i32_15 = arith.constant 0 : i32
    %c0_i32_16 = arith.constant 0 : i32
    %5 = tpu.memref_slice %arg1[%c0_i32_13, %c0_i32_14, %c0_i32_15, %c0_i32_16] : memref<2x4x16x16xf32, #tpu.memory_space<any>> -> memref<2x4x16x16xf32, #tpu.memory_space<any>>
    %6 = tpu.memref_slice %arg2[%c0_i32_8] : memref<1x!tpu.dma_semaphore, #tpu.memory_space<semaphore_mem>> -> memref<1x!tpu.dma_semaphore, #tpu.memory_space<semaphore_mem>>
    %7 = tpu.memref_squeeze %6 : memref<1x!tpu.dma_semaphore, #tpu.memory_space<semaphore_mem>> -> memref<!tpu.dma_semaphore, #tpu.memory_space<semaphore_mem>>
    tpu.wait_dma2 semaphore(%7 : memref<!tpu.dma_semaphore, #tpu.memory_space<semaphore_mem>>) src(%4 : memref<2x4x16x16xf32, #tpu.memory_space<any>>) dst(%5 : memref<2x4x16x16xf32, #tpu.memory_space<any>>)
    return
  }
}

</mosaic_0001>

<bundles_post_ra>
// kernel: tpu_custom_call.1
= control target key start
LH: loop header
LB: loop body
LE: loop exit
PB: predicated region body
PF: predicated region fallthrough
CT: control target
= control target key end

     0   :  { %s34_s12 = smov [#allocation2]   ;;  %s35_s13 = smov [#allocation3]   ;;  %s53_s0 = inlined_call_operand.hbm [shape: f32[2,4,16,16], index: 0, kind: input, shape index: {}]   ;;  %s54_s1 = inlined_call_operand.hbm [shape: f32[2,4,16,16], index: 1, kind: output, shape index: {}]  }
   0x1   :  { %s10_s8 = sshll.u32 %s53_s0, 4  ;;  %s12_s11 = sshll.u32 %s54_s1, 4  ;;  %s11_s8 = int_to_ptr.hbm [resolvable:$true] %s10_s8  ;;  %s13_s11 = int_to_ptr.hbm [resolvable:$true] %s12_s11 }
   0x2   :  { %s36_s14 = smov 0  }
   0x3   :  { %16 = dma.general %s11_s8, 2048, %s13_s11, %s34_s12, %s35_s13, [#allocation4], %s36_s14, 0  }
   0x4   :  { %32 = dma.done.wait [#allocation2], 2048 }
   0x5   :  { %33 = vsyncadd [#allocation2], 4294965248 }
   0x6   :  { %22 = vsyncmov [#allocation2] }
   0x9   :  { %s23_s15 = vpop.sfrf %22 }
   0xa   :  { %p28_p0 = scmp.ne.s32.totalorder %s23_s15, 0 }
   0xc   :  { %27 = shalt.err (%p28_p0)  }

</bundles_post_ra>
